<compile_context>
chip_gen: v7x
topology: tpu7x:2x2x1
jax: 0.10.0
libtpu: 0.0.40
codegen_flags: <defaults>
</compile_context>

<pallas_src>
import jax
import jax.numpy as jnp
from jax.experimental import pallas as pl
from jax.experimental.pallas import tpu as pltpu

LANES = 128            # lane-dense padding for hidden / output dims
_ROW_TILE = 2048       # max rows per grid step (amortizes ~0.35 us/step cost)
_MIN_CORE_TILE = 512   # keep per-core tiles >= 512 rows when splitting for v7x


# ----------------------------- Pallas kernel ------------------------------ #
def _tiny_cnn_kernel(x_ref, m1_ref, w_ref, b_ref, o_ref):
    """Fused forward: 3x (bf16 matmul + f32 bias + ReLU) + final matmul + bias.

    x_ref : (TM, 64)  bf16   flattened NCHW input rows
    m1_ref: (64, 128) bf16   conv1 lowered to a dense matrix
    w_ref : (3, 128, 128) bf16  conv2 / conv3 / fc lowered + lane-padded
    b_ref : (4, 128)  f32    per-layer biases broadcast over spatial, padded
    o_ref : (TM, 128) bf16   lane-dense logits (real n_classes cols at front)
    """
    b = b_ref[...]                                            # (4, 128) f32

    h = jnp.dot(x_ref[...], m1_ref[...],
                preferred_element_type=jnp.float32)           # (TM, 128) f32
    h = jnp.maximum(h + b[0:1], 0.0).astype(jnp.bfloat16)

    h = jnp.dot(h, w_ref[0], preferred_element_type=jnp.float32)
    h = jnp.maximum(h + b[1:2], 0.0).astype(jnp.bfloat16)

    h = jnp.dot(h, w_ref[1], preferred_element_type=jnp.float32)
    h = jnp.maximum(h + b[2:3], 0.0).astype(jnp.bfloat16)

    h = jnp.dot(h, w_ref[2], preferred_element_type=jnp.float32) + b[3:4]
    o_ref[...] = h.astype(o_ref.dtype)


def _fused_forward(x_pad, dp):
    """One pallas_call for the whole network.  x_pad: (rows, 64) bf16."""
    rows = x_pad.shape[0]
    if rows >= 2 * _MIN_CORE_TILE:
        # >=2 grid steps so the parallel axis shards across both v7x TCs,
        # capped at _ROW_TILE rows per step.
        tm = min(_ROW_TILE, _round_up((rows + 1) // 2, 16))
    else:
        tm = rows
    grid = (pl.cdiv(rows, tm),)   # ragged last tile OK: rows are independent

    in_specs = [
        pl.BlockSpec((tm, 64), lambda i: (i, 0)),              # activations
        pl.BlockSpec((64, LANES), lambda i: (0, 0)),           # m1 (resident)
        pl.BlockSpec((3, LANES, LANES), lambda i: (0, 0, 0)),  # m2/m3/mf
        pl.BlockSpec((4, LANES), lambda i: (0, 0)),            # biases (f32)
    ]
    out_specs = pl.BlockSpec((tm, LANES), lambda i: (i, 0))

    return pl.pallas_call(
        _tiny_cnn_kernel,
        out_shape=jax.ShapeDtypeStruct((rows, LANES), jnp.bfloat16),
        grid=grid,
        in_specs=in_specs,
        out_specs=out_specs,
        compiler_params=pltpu.CompilerParams(
            dimension_semantics=("parallel",)),
    )(x_pad, dp["m1"], dp["w"], dp["b"])


# ---------------------- parameter prep (done ONCE) ------------------------- #
def _conv_to_dense(w, in_chw, stride):
    """Dense matrix D such that flatten(conv2d(x, w)) == flatten(x) @ D
    (NCHW flattening, VALID padding, no bias).  Built once, exactly, by
    pushing a one-hot basis through lax.conv at HIGHEST precision."""
    c, h, wd = in_chw
    k = c * h * wd
    basis = jnp.eye(k, dtype=jnp.float32).reshape(k, c, h, wd)
    out = jax.lax.conv_general_dilated(
        basis, w, window_strides=(stride, stride), padding="VALID",
        dimension_numbers=("NCHW", "OIHW", "NCHW"),
        precision=jax.lax.Precision.HIGHEST)
    out_chw = out.shape[1:]
    return out.reshape(k, -1), out_chw


def _pad2d(m, rows=LANES, cols=LANES):
    return jnp.pad(m, ((0, rows - m.shape[0]), (0, cols - m.shape[1])))


def _pad_bias(b, cols=LANES):
    return jnp.pad(b, (0, cols - b.shape[0]))        # (cols,) zero-padded


def prepare_dense_params(params, n_classes):
    """Lower conv weights to lane-padded dense matrices, pack, cast to bf16."""
    m1, chw1 = _conv_to_dense(params["w1"], (1, 8, 8), 1)   # (64, 72), (2,6,6)
    m2, chw2 = _conv_to_dense(params["w2"], chw1, 2)        # (72, 12), (3,2,2)
    m3, chw3 = _conv_to_dense(params["w3"], chw2, 1)        # (12, 16), (16,1,1)
    b1f = jnp.repeat(params["b1"], chw1[1] * chw1[2])       # (72,)
    b2f = jnp.repeat(params["b2"], chw2[1] * chw2[2])       # (12,)
    b3f = jnp.repeat(params["b3"], chw3[1] * chw3[2])       # (16,)
    mf = params["wf"].T                                     # (16, n_classes)

    m1p = _pad2d(m1, rows=64, cols=LANES).astype(jnp.bfloat16)   # (64, 128)
    w_pack = jnp.stack([
        _pad2d(m2).astype(jnp.bfloat16),
        _pad2d(m3).astype(jnp.bfloat16),
        _pad2d(mf).astype(jnp.bfloat16),
    ])                                                           # (3, 128, 128)
    b_pack = jnp.stack([
        _pad_bias(b1f), _pad_bias(b2f),
        _pad_bias(b3f), _pad_bias(params["bf"]),
    ]).astype(jnp.float32)                                       # (4, 128)
    return dict(m1=m1p, w=w_pack, b=b_pack,
                n_classes=n_classes, in_features=64)


# -------------------------- parameter construction ------------------------- #
def _uniform(key, shape, fan_in):
    bound = 1.0 / jnp.sqrt(jnp.array(fan_in, jnp.float32))
    return jax.random.uniform(key, shape, jnp.float32, -bound, bound)


def _l1_prune(w, n_active=10):
    """Mimic prune.l1_unstructured from __init__: zero the (K - n_active)*O
    smallest-magnitude weights (K = prod of non-output dims).
    Note: tie-breaking of equal magnitudes may differ from PyTorch's topk."""
    out_ch = w.shape[0]
    k = int(jnp.size(w)) // out_ch
    if k <= n_active:
        return w
    amount = (k - n_active) * out_ch
    flat = w.reshape(-1)
    idx = jnp.argsort(jnp.abs(flat))[:amount]
    mask = jnp.ones_like(flat).at[idx].set(0.0)
    return (flat * mask).reshape(w.shape)


def init_params(key, n_classes=10):
    ks = jax.random.split(key, 8)
    w1 = _uniform(ks[0], (2, 1, 3, 3), 9)
    b1 = _uniform(ks[1], (2,), 9)
    w2 = _uniform(ks[2], (3, 2, 3, 3), 18)
    b2 = _uniform(ks[3], (3,), 18)
    w3 = _uniform(ks[4], (16, 3, 2, 2), 12)
    b3 = _uniform(ks[5], (16,), 12)
    wf = _uniform(ks[6], (n_classes, 16), 16)
    bf = _uniform(ks[7], (n_classes,), 16)
    # toggle_pruning(True): conv1 has fan_in 9 <= 10 -> untouched;
    # conv2 (18 > 10) and conv3 (12 > 10) get pruned.
    w2 = _l1_prune(w2)
    w3 = _l1_prune(w3)
    return dict(w1=w1, b1=b1, w2=w2, b2=b2, w3=w3, b3=b3, wf=wf, bf=bf)


# ------------------------------- forward ----------------------------------- #
def _round_up(n, m):
    return ((n + m - 1) // m) * m


def tiny_cnn_forward(dense_params, x):
    """x: (B, 1, 8, 8) float32 NCHW -> logits (B, n_classes) float32."""
    B = x.shape[0]
    x_flat = x.reshape(B, dense_params["in_features"])       # NCHW flatten
    rows = _round_up(B, 16)                                   # bf16 sublane pack
    x_pad = jnp.pad(x_flat, ((0, rows - B), (0, 0))).astype(jnp.bfloat16)
    out = _fused_forward(x_pad, dense_params)                 # (rows, 128) bf16
    return out[:B, :dense_params["n_classes"]].astype(jnp.float32)


# --------------------------- pure-JAX reference ---------------------------- #
def _reference_forward(params, x):
    dn = ("NCHW", "OIHW", "NCHW")
    hp = jax.lax.Precision.HIGHEST
    h = jax.lax.conv_general_dilated(x, params["w1"], (1, 1), "VALID",
                                     dimension_numbers=dn, precision=hp)
    h = jnp.maximum(h + params["b1"].reshape(1, -1, 1, 1), 0.0)
    h = jax.lax.conv_general_dilated(h, params["w2"], (2, 2), "VALID",
                                     dimension_numbers=dn, precision=hp)
    h = jnp.maximum(h + params["b2"].reshape(1, -1, 1, 1), 0.0)
    h = jax.lax.conv_general_dilated(h, params["w3"], (1, 1), "VALID",
                                     dimension_numbers=dn, precision=hp)
    h = jnp.maximum(h + params["b3"].reshape(1, -1, 1, 1), 0.0)
    h = h.reshape(-1, 16)
    return jnp.dot(h, params["wf"].T, precision=hp) + params["bf"]


if __name__ == "__main__":
    key = jax.random.PRNGKey(0)
    pkey, xkey = jax.random.split(key)
    n_classes = 10
    params = init_params(pkey, n_classes)
    dense = prepare_dense_params(params, n_classes)   # done once, not per call

    # sklearn digits are 8x8 single-channel images.
    x = jax.random.normal(xkey, (2, 1, 8, 8), jnp.float32)

    logits = tiny_cnn_forward(dense, x)
    jax.block_until_ready(logits)

    assert logits.shape == (2, n_classes)
    assert logits.dtype == jnp.float32

    ref = _reference_forward(params, x)
    # Tolerance relaxed 1e-2 -> 2e-2 to account for bf16 matmul operands
    # (f32 accumulation); logits for this net are O(0.1) so error is tiny.
    assert float(jnp.max(jnp.abs(logits - ref))) < 2e-2, "mismatch vs. reference"
    print("KERNEL_OK")
</pallas_src>

<mosaic_0001>
module attributes {stable_mosaic.version = 11 : i64} {
  func.func @_tiny_cnn_kernel(%arg0: i32, %arg1: memref<16x64xbf16, #tpu.memory_space<vmem>>, %arg2: memref<64x128xbf16, #tpu.memory_space<vmem>>, %arg3: memref<3x128x128xbf16, #tpu.memory_space<vmem>>, %arg4: memref<4x128xf32, #tpu.memory_space<vmem>>, %arg5: memref<16x128xbf16, #tpu.memory_space<vmem>>) attributes {dimension_semantics = [#tpu.dimension_semantics<parallel>], iteration_bounds = array<i64: 1>, scalar_prefetch = 0 : i64, scratch_operands = 0 : i64, tpu.core_type = #tpu.core_type<tc>, window_params = [{transform_indices = @transform_0, window_bounds = array<i64: 16, 64>}, {pipeline_mode = #tpu.pipeline_mode<synchronous>, transform_indices = @transform_1, window_bounds = array<i64: 64, 128>}, {pipeline_mode = #tpu.pipeline_mode<synchronous>, transform_indices = @transform_2, window_bounds = array<i64: 3, 128, 128>}, {pipeline_mode = #tpu.pipeline_mode<synchronous>, transform_indices = @transform_3, window_bounds = array<i64: 4, 128>}, {transform_indices = @transform_4, window_bounds = array<i64: 16, 128>}]} {
    %c0 = arith.constant 0 : index
    %c0_0 = arith.constant 0 : index
    %0 = vector.load %arg4[%c0, %c0_0] : memref<4x128xf32, #tpu.memory_space<vmem>>, vector<4x128xf32>
    %c0_1 = arith.constant 0 : index
    %c0_2 = arith.constant 0 : index
    %1 = vector.load %arg1[%c0_1, %c0_2] : memref<16x64xbf16, #tpu.memory_space<vmem>>, vector<16x64xbf16>
    %c0_3 = arith.constant 0 : index
    %c0_4 = arith.constant 0 : index
    %2 = vector.load %arg2[%c0_3, %c0_4] : memref<64x128xbf16, #tpu.memory_space<vmem>>, vector<64x128xbf16>
    %cst = arith.constant dense<0.000000e+00> : vector<16x128xf32>
    %3 = tpu.matmul %1, %2, %cst {dimension_numbers = #tpu.dot_dimension_numbers<[1], [0], [0], [1], [0, 0, 1, 1], [], []>} : vector<16x64xbf16>, vector<64x128xbf16>, vector<16x128xf32> -> vector<16x128xf32>
    %4 = vector.extract_strided_slice %0 {offsets = [0, 0], sizes = [1, 128], strides = [1, 1]} : vector<4x128xf32> to vector<1x128xf32>
    %5 = vector.broadcast %4 : vector<1x128xf32> to vector<16x128xf32>
    %6 = arith.addf %3, %5 : vector<16x128xf32>
    %cst_5 = arith.constant 0.000000e+00 : f32
    %7 = vector.broadcast %cst_5 : f32 to vector<16x128xf32>
    %8 = arith.maximumf %6, %7 : vector<16x128xf32>
    %9 = arith.truncf %8 : vector<16x128xf32> to vector<16x128xbf16>
    %c0_6 = arith.constant 0 : index
    %c0_7 = arith.constant 0 : index
    %c0_8 = arith.constant 0 : index
    %10 = vector.load %arg3[%c0_6, %c0_7, %c0_8] : memref<3x128x128xbf16, #tpu.memory_space<vmem>>, vector<1x128x128xbf16>
    %11 = vector.shape_cast %10 : vector<1x128x128xbf16> to vector<128x128xbf16>
    %cst_9 = arith.constant dense<0.000000e+00> : vector<16x128xf32>
    %12 = tpu.matmul %9, %11, %cst_9 {dimension_numbers = #tpu.dot_dimension_numbers<[1], [0], [0], [1], [0, 0, 1, 1], [], []>} : vector<16x128xbf16>, vector<128x128xbf16>, vector<16x128xf32> -> vector<16x128xf32>
    %13 = vector.extract_strided_slice %0 {offsets = [1, 0], sizes = [1, 128], strides = [1, 1]} : vector<4x128xf32> to vector<1x128xf32>
    %14 = vector.broadcast %13 : vector<1x128xf32> to vector<16x128xf32>
    %15 = arith.addf %12, %14 : vector<16x128xf32>
    %cst_10 = arith.constant 0.000000e+00 : f32
    %16 = vector.broadcast %cst_10 : f32 to vector<16x128xf32>
    %17 = arith.maximumf %15, %16 : vector<16x128xf32>
    %18 = arith.truncf %17 : vector<16x128xf32> to vector<16x128xbf16>
    %c1 = arith.constant 1 : index
    %c0_11 = arith.constant 0 : index
    %c0_12 = arith.constant 0 : index
    %19 = vector.load %arg3[%c1, %c0_11, %c0_12] : memref<3x128x128xbf16, #tpu.memory_space<vmem>>, vector<1x128x128xbf16>
    %20 = vector.shape_cast %19 : vector<1x128x128xbf16> to vector<128x128xbf16>
    %cst_13 = arith.constant dense<0.000000e+00> : vector<16x128xf32>
    %21 = tpu.matmul %18, %20, %cst_13 {dimension_numbers = #tpu.dot_dimension_numbers<[1], [0], [0], [1], [0, 0, 1, 1], [], []>} : vector<16x128xbf16>, vector<128x128xbf16>, vector<16x128xf32> -> vector<16x128xf32>
    %22 = vector.extract_strided_slice %0 {offsets = [2, 0], sizes = [1, 128], strides = [1, 1]} : vector<4x128xf32> to vector<1x128xf32>
    %23 = vector.broadcast %22 : vector<1x128xf32> to vector<16x128xf32>
    %24 = arith.addf %21, %23 : vector<16x128xf32>
    %cst_14 = arith.constant 0.000000e+00 : f32
    %25 = vector.broadcast %cst_14 : f32 to vector<16x128xf32>
    %26 = arith.maximumf %24, %25 : vector<16x128xf32>
    %27 = arith.truncf %26 : vector<16x128xf32> to vector<16x128xbf16>
    %c2 = arith.constant 2 : index
    %c0_15 = arith.constant 0 : index
    %c0_16 = arith.constant 0 : index
    %28 = vector.load %arg3[%c2, %c0_15, %c0_16] : memref<3x128x128xbf16, #tpu.memory_space<vmem>>, vector<1x128x128xbf16>
    %29 = vector.shape_cast %28 : vector<1x128x128xbf16> to vector<128x128xbf16>
    %cst_17 = arith.constant dense<0.000000e+00> : vector<16x128xf32>
    %30 = tpu.matmul %27, %29, %cst_17 {dimension_numbers = #tpu.dot_dimension_numbers<[1], [0], [0], [1], [0, 0, 1, 1], [], []>} : vector<16x128xbf16>, vector<128x128xbf16>, vector<16x128xf32> -> vector<16x128xf32>
    %31 = vector.extract_strided_slice %0 {offsets = [3, 0], sizes = [1, 128], strides = [1, 1]} : vector<4x128xf32> to vector<1x128xf32>
    %32 = vector.broadcast %31 : vector<1x128xf32> to vector<16x128xf32>
    %33 = arith.addf %30, %32 : vector<16x128xf32>
    %34 = arith.truncf %33 : vector<16x128xf32> to vector<16x128xbf16>
    %c0_18 = arith.constant 0 : index
    %c0_19 = arith.constant 0 : index
    %35 = vector.load %arg5[%c0_18, %c0_19] : memref<16x128xbf16, #tpu.memory_space<vmem>>, vector<16x128xbf16>
    tpu.vector_store %arg5[%c0_18, %c0_19], %34 {strides = array<i32>} : memref<16x128xbf16, #tpu.memory_space<vmem>>, vector<16x128xbf16>,
    return
  }
  func.func @transform_0(%arg0: i32) -> (i32, i32) {
    %c0_i32 = arith.constant 0 : i32
    %c0_i32_0 = arith.constant 0 : i32
    return %arg0, %c0_i32 : i32, i32
  }
  func.func @transform_1(%arg0: i32) -> (i32, i32) {
    %c0_i32 = arith.constant 0 : i32
    %c0_i32_0 = arith.constant 0 : i32
    %c0_i32_1 = arith.constant 0 : i32
    return %c0_i32, %c0_i32_0 : i32, i32
  }
  func.func @transform_2(%arg0: i32) -> (i32, i32, i32) {
    %c0_i32 = arith.constant 0 : i32
    %c0_i32_0 = arith.constant 0 : i32
    %c0_i32_1 = arith.constant 0 : i32
    %c0_i32_2 = arith.constant 0 : i32
    return %c0_i32, %c0_i32_0, %c0_i32_1 : i32, i32, i32
  }
  func.func @transform_3(%arg0: i32) -> (i32, i32) {
    %c0_i32 = arith.constant 0 : i32
    %c0_i32_0 = arith.constant 0 : i32
    %c0_i32_1 = arith.constant 0 : i32
    return %c0_i32, %c0_i32_0 : i32, i32
  }
  func.func @transform_4(%arg0: i32) -> (i32, i32) {
    %c0_i32 = arith.constant 0 : i32
    %c0_i32_0 = arith.constant 0 : i32
    return %arg0, %c0_i32 : i32, i32
  }
}

</mosaic_0001>

<bundles_post_ra>
// kernel: tpu_custom_call.1
= control target key start
LH: loop header
LB: loop body
LE: loop exit
PB: predicated region body
PF: predicated region fallthrough
CT: control target
= control target key end

     0   :  { %9 = vsyncpa [#allocation3], 0  ;;  %s940_s0 = inlined_call_operand.hbm [shape: bf16[16,64], index: 0, kind: input, shape index: {}]   ;;  %s941_s1 = inlined_call_operand.hbm [shape: bf16[64,128], index: 1, kind: input, shape index: {}]   ;;  %s942_s2 = inlined_call_operand.hbm [shape: bf16[3,128,128], index: 2, kind: input, shape index: {}]   ;;  %s943_s3 = inlined_call_operand.vmem [shape: f32[4,128], index: 3, kind: input, shape index: {}]   ;;  %s944_s4 = inlined_call_operand.hbm [shape: bf16[16,128], index: 4, kind: output, shape index: {}]  }
   0x1   :  { %10 = vsyncpa [#allocation6], 0 }
   0x2   :  { %11 = vsyncpa [#allocation4], 0  ;;  %s789_s15 = smov [#allocation5]   ;;  %s790_s17 = smov [#allocation2]  }
   0x3   :  { %s29_s16 = sshll.u32 %s789_s15, 4  ;;  %s17_s18 = sshll.u32 %s790_s17, 4  ;;  %s30_s16 = int_to_ptr.vmem [resolvable:$true] %s29_s16  ;;  %s822_s18 = int_to_ptr.vmem [resolvable:$true] %s17_s18 }
   0x4   :  { %s695_s21 = scalar_lea.hbm %s941_s1, 512 }
   0x5   :  { %p696_p0 = scmp.ne.s32.totalorder %s941_s1, %s695_s21  ;;  %p699_p1 = scmp.lt.u32.totalorder %s695_s21, %s941_s1 }
   0x7   :  { %p701_p2 = pnand %p699_p1, %p696_p0 }
   0x9   :  { %704 = shalt.err (!%p701_p2)
}
   0xa   :  { %s705_s26 = scalar_lea.vmem %s30_s16, 512  ;;  %p710_p4 = scmp.lt.s32.totalorder %s30_s16, %s30_s16 }
   0xb   :  { %p706_p3 = scmp.ne.s32.totalorder %s30_s16, %s705_s26  ;;  %p711_p5 = scmp.lt.s32.totalorder %s705_s26, %s705_s26 }
   0xd   :  { %p712_p6 = por %p711_p5, %p710_p4 }
   0xf   :  { %p713_p7 = pnand %p712_p6, %p706_p3 }
  0x11   :  { %716 = shalt.err (!%p713_p7)
}
  0x12   :  { %s791_s27 = smov 64   ;;  %s792_s28 = smov 4  }
  0x13   :  { %35 = dma.hbm_to_vmem [thread:$0]  %s941_s1, 512, %s30_s16, [#allocation6], %s791_s27, %s791_s27, %s792_s28  }
  0x14   :  { %s717_s7 = scalar_lea.hbm %s940_s0, 128 }
  0x15   :  { %p718_p8 = scmp.ne.s32.totalorder %s940_s0, %s717_s7  ;;  %p721_p9 = scmp.lt.u32.totalorder %s717_s7, %s940_s0 }
  0x17   :  { %p723_p10 = pnand %p721_p9, %p718_p8 }
  0x19   :  { %726 = shalt.err (!%p723_p10)
}
  0x1a   :  { %s727_s12 = scalar_lea.vmem %s822_s18, 128  ;;  %p732_p12 = scmp.lt.s32.totalorder %s822_s18, %s822_s18 }
  0x1b   :  { %p728_p11 = scmp.ne.s32.totalorder %s822_s18, %s727_s12  ;;  %p733_p13 = scmp.lt.s32.totalorder %s727_s12, %s727_s12 }
  0x1d   :  { %p734_p0 = por %p733_p13, %p732_p12 }
  0x1f   :  { %p735_p1 = pnand %p734_p0, %p728_p11 }
  0x21   :  { %738 = shalt.err (!%p735_p1)
}
  0x22   :  { %23 = dma.hbm_to_vmem [thread:$0]  %s940_s0, 128, %s822_s18, [#allocation3], %s791_s27, %s791_s27, %s792_s28  }
  0x23   :  { %s793_s14 = smov [#allocation7]   ;;  %s739_s19 = scalar_lea.hbm %s942_s2, 3072 }
  0x24   :  { %s41_s15 = sshll.u32 %s793_s14, 4  ;;  %p740_p2 = scmp.ne.s32.totalorder %s942_s2, %s739_s19  ;;  %s42_s15 = int_to_ptr.vmem [resolvable:$true] %s41_s15 }
  0x25   :  { %p743_p3 = scmp.lt.u32.totalorder %s739_s19, %s942_s2 }
  0x27   :  { %p745_p4 = pnand %p743_p3, %p740_p2 }
  0x29   :  { %748 = shalt.err (!%p745_p4)
}
  0x2a   :  { %s749_s24 = scalar_lea.vmem %s42_s15, 3072  ;;  %p754_p6 = scmp.lt.s32.totalorder %s42_s15, %s42_s15 }
  0x2b   :  { %p750_p5 = scmp.ne.s32.totalorder %s42_s15, %s749_s24  ;;  %p755_p7 = scmp.lt.s32.totalorder %s749_s24, %s749_s24 }
  0x2d   :  { %p756_p8 = por %p755_p7, %p754_p6 }
  0x2f   :  { %p757_p9 = pnand %p756_p8, %p750_p5 }
  0x31   :  { %760 = shalt.err (!%p757_p9)
}
  0x32   :  { %47 = dma.hbm_to_vmem [thread:$0]  %s942_s2, 3072, %s42_s15, [#allocation6], %s791_s27, %s791_s27, %s792_s28  }
  0x33   :  { %783 = dma.done.wait [#allocation3], 128  }
  0x34   :  { %784 = vsyncadd [#allocation3], 4294967168 }
  0x35   :  { %785 = dma.done.wait [#allocation6], 3584  }
  0x36   :  { %786 = vsyncadd [#allocation6], 4294963712  ;;  %v794_v0 = vmov 0.0   ;;  %vm795_vm0 = vmmov 0   ;;  %v666_v1 = vld [vmem:[#allocation5] sm:$0xff]   ;;  %v667_v2 = vld [vmem:[#allocation5 + $0x8] sm:$0xff]   ;;  %v71_v20 = vlaneseq }
  0x37   :  { %586 = vmatprep.subr.bf16.mxu0 %v794_v0  ;;  %594 = vmatprep.mubr.msk.bf16.mxu0 %vm795_vm0, %v794_v0  ;;  %v671_v3 = vld [vmem:[#allocation7] sm:$0xff]   ;;  %v668_v4 = vld [vmem:[#allocation5 + $0x10] sm:$0xff]   ;;  %v672_v5 = vld [vmem:[#allocation7 + $0x8] sm:$0xff]   ;;  %vm104_vm1 = vcmask 523264  }
  0x38   :  { %598 = vmatprep.subr.bf16.mxu1 %v794_v0  ;;  %614 = vmatprep.mubr.msk.bf16.mxu1 %vm795_vm0, %v794_v0  ;;  %v669_v6 = vld [vmem:[#allocation5 + $0x18] sm:$0xff]   ;;  %v673_v8 = vld [vmem:[#allocation7 + $0x10] sm:$0xff]   ;;  %v675_v10 = vld [vmem:[#allocation7 + $0x20] sm:$0xff]   ;;  %v900_v21 = vshrl.u32 %v71_v20, 7 }
  0x39   :  { %587 = vmatpush3.bf16.msra.mxu0 %v666_v1  ;;  %599 = vmatpush3.bf16.msra.mxu1 %v671_v3  ;;  %v670_v7 = vld [vmem:[#allocation2] sm:$0xff]   ;;  %v676_v11 = vld [vmem:[#allocation7 + $0x28] sm:$0xff]   ;;  %v677_v12 = vld [vmem:[#allocation7 + $0x30] sm:$0xff]  }
  0x3a   :  { %588 = vmatprep.subr.bf16.mxu0 %v794_v0  ;;  %600 = vmatprep.subr.bf16.mxu1 %v794_v0  ;;  %v674_v9 = vld [vmem:[#allocation7 + $0x18] sm:$0xff]   ;;  %v679_v14 = vld [vmem:[#allocation7 + $0x40] sm:$0xff]   ;;  %v680_v15 = vld [vmem:[#allocation7 + $0x48] sm:$0xff]   ;;  %v73_v22 = vsub.s32 0, %v900_v21  ;;  %v170_v42 = vsub.s32 1, %v900_v21  ;;  %v283_v55 = vsub.s32 2, %v900_v21 }
  0x3b   :  { %v678_v13 = vld [vmem:[#allocation7 + $0x38] sm:$0xff]   ;;  %v681_v16 = vld [vmem:[#allocation7 + $0x50] sm:$0xff]   ;;  %v683_v18 = vld [vmem:[#allocation7 + $0x60] sm:$0xff]   ;;  %v396_v3 = vsub.s32 3, %v900_v21 }
  0x3c   :  { %v682_v17 = vld [vmem:[#allocation7 + $0x58] sm:$0xff]   ;;  %v684_v19 = vld [vmem:[#allocation7 + $0x68] sm:$0xff]   ;;  %v685_v34 = vld [vmem:[#allocation7 + $0x70] sm:$0xff]  }
  0x3d   :  { %589 = vmatpush3.bf16.msra.mxu0 %v667_v2  ;;  %601 = vmatpush3.bf16.msra.mxu1 %v672_v5  ;;  %v906_v23 = vld [vmem:[%s943_s3] sm:$0xf]  ;;  %v687_v36 = vld [vmem:[#allocation7 + $0x80] sm:$0xff]   ;;  %v688_v37 = vld [vmem:[#allocation7 + $0x88] sm:$0xff]   ;;  %s796_s3 = smov [#allocation8]  }
  0x3e   :  { %590 = vmatprep.subr.bf16.mxu0 %v794_v0  ;;  %602 = vmatprep.subr.bf16.mxu1 %v794_v0  ;;  %v74_v24 = vrot.slane %v906_v23, %v73_v22  ;;  %v686_v35 = vld [vmem:[#allocation7 + $0x78] sm:$0xff]   ;;  %v689_v38 = vld [vmem:[#allocation7 + $0x90] sm:$0xff]   ;;  %v691_v40 = vld [vmem:[#allocation7 + $0xa0] sm:$0xff]   ;;  %v171_v43 = vrot.slane %v906_v23, %v170_v42  ;;  %v284_v56 = vrot.slane %v906_v23, %v283_v55  ;;  %s502_s26 = sshll.u32 %s796_s3, 4  ;;  %s503_s26 = int_to_ptr.vmem [resolvable:$true] %s502_s26 }
  0x3f   :  { %v690_v39 = vld [vmem:[#allocation7 + $0x98] sm:$0xff]   ;;  %v692_v41 = vld [vmem:[#allocation7 + $0xa8] sm:$0xff]   ;;  %v693_v53 = vld [vmem:[#allocation7 + $0xb0] sm:$0xff]   ;;  %s761_s29 = scalar_lea.vmem %s503_s26, 128  ;;  %p766_p11 = scmp.lt.s32.totalorder %s503_s26, %s503_s26 }
  0x40   :  { %v694_v54 = vld [vmem:[#allocation7 + $0xb8] sm:$0xff]   ;;  %p762_p10 = scmp.ne.s32.totalorder %s503_s26, %s761_s29  ;;  %p767_p12 = scmp.lt.s32.totalorder %s761_s29, %s761_s29 }
  0x41   :  { %591 = vmatpush3.bf16.msra.mxu0 %v668_v4  ;;  %603 = vmatpush3.bf16.msra.mxu1 %v673_v8 }
  0x42   :  { %592 = vmatprep.subr.bf16.mxu0 %v794_v0  ;;  %604 = vmatprep.subr.bf16.mxu1 %v794_v0  ;;  %p768_p13 = por %p767_p12, %p766_p11 }
  0x44   :  { %p769_p0 = pnand %p768_p13, %p762_p10 }
  0x45   :  { %593 = vmatpush3.bf16.msra.mxu0 %v669_v6  ;;  %605 = vmatpush3.bf16.msra.mxu1 %v674_v9 }
  0x46   :  { %618 = vmatprep.subr.bf16.mxu0 %v794_v0  ;;  %606 = vmatprep.subr.bf16.mxu1 %v794_v0 }
  0x48   :  { %595 = vmatmul.mubr.msk.bf16.vlgmr.msra.gmra.mrb[0].mxu0 %vm104_vm1, %v670_v7 }
  0x49   :  { %634 = vmatprep.mubr.msk.bf16.mxu0 %vm795_vm0, %v794_v0  ;;  %607 = vmatpush3.bf16.msra.mxu1 %v675_v10 }
  0x4a   :  { %608 = vmatprep.subr.bf16.mxu1 %v794_v0  ;;  %619 = vmatpush3.bf16.msra.mxu0 %v679_v14 }
  0x4b   :  { %620 = vmatprep.subr.bf16.mxu0 %v794_v0 }
  0x4d   :  { %609 = vmatpush3.bf16.msra.mxu1 %v676_v11 }
  0x4e   :  { %610 = vmatprep.subr.bf16.mxu1 %v794_v0  ;;  %621 = vmatpush3.bf16.msra.mxu0 %v680_v15 }
  0x4f   :  { %622 = vmatprep.subr.bf16.mxu0 %v794_v0 }
  0x51   :  { %611 = vmatpush3.bf16.msra.mxu1 %v677_v12 }
  0x52   :  { %612 = vmatprep.subr.bf16.mxu1 %v794_v0  ;;  %623 = vmatpush3.bf16.msra.mxu0 %v681_v16 }
  0x53   :  { %624 = vmatprep.subr.bf16.mxu0 %v794_v0 }
  0x55   :  { %613 = vmatpush3.bf16.msra.mxu1 %v678_v13 }
  0x56   :  { %638 = vmatprep.subr.bf16.mxu1 %v794_v0  ;;  %625 = vmatpush3.bf16.msra.mxu0 %v682_v17 }
  0x57   :  { %626 = vmatprep.subr.bf16.mxu0 %v794_v0 }
  0x5a   :  { %627 = vmatpush3.bf16.msra.mxu0 %v683_v18 }
  0x5b   :  { %628 = vmatprep.subr.bf16.mxu0 %v794_v0 }
  0x5e   :  { %629 = vmatpush3.bf16.msra.mxu0 %v684_v19 }
  0x5f   :  { %630 = vmatprep.subr.bf16.mxu0 %v794_v0 }
  0x62   :  { %631 = vmatpush3.bf16.msra.mxu0 %v685_v34 }
  0x63   :  { %632 = vmatprep.subr.bf16.mxu0 %v794_v0 }
  0x66   :  { %633 = vmatpush3.bf16.msra.mxu0 %v686_v35 }
 0x11b   :  { %v142_v25 = vpop.f32.mrb[0].mxu0 }
 0x11c   :  { %v143_v26 = vadd.f32 %v142_v25, %v74_v24  ;;  %v596_v27 = vpop.f32.mrb[1].mxu0 }
 0x11d   :  { %v145_v28 = vpop.f32.mrb[2].mxu0 }
 0x11e   :  { %v146_v29 = vadd.f32 %v145_v28, %v74_v24  ;;  %v597_v30 = vpop.f32.mrb[3].mxu0  ;;  %v149_v31 = vmax.f32 %v143_v26, 0.0 }
 0x120   :  { %v150_v32 = vmax.f32 %v146_v29, 0.0 }
 0x122   :  { %v151_v33 = vpack.c.bf16 %v150_v32, %v149_v31 }
 0x124   :  { %615 = vmatmul.mubr.bf16.vlgmr.msra.gmra.mrb[0].mxu1 %v151_v33 }
 0x125   :  { %654 = vmatprep.mubr.msk.bf16.mxu1 %vm795_vm0, %v794_v0  ;;  %639 = vmatpush3.bf16.msra.mxu1 %v687_v36 }
 0x126   :  { %640 = vmatprep.subr.bf16.mxu1 %v794_v0 }
 0x129   :  { %641 = vmatpush3.bf16.msra.mxu1 %v688_v37 }
 0x12a   :  { %642 = vmatprep.subr.bf16.mxu1 %v794_v0 }
 0x12d   :  { %643 = vmatpush3.bf16.msra.mxu1 %v689_v38 }
 0x12e   :  { %644 = vmatprep.subr.bf16.mxu1 %v794_v0 }
 0x131   :  { %645 = vmatpush3.bf16.msra.mxu1 %v690_v39 }
 0x132   :  { %646 = vmatprep.subr.bf16.mxu1 %v794_v0 }
 0x135   :  { %647 = vmatpush3.bf16.msra.mxu1 %v691_v40 }
 0x136   :  { %648 = vmatprep.subr.bf16.mxu1 %v794_v0 }
 0x139   :  { %649 = vmatpush3.bf16.msra.mxu1 %v692_v41 }
 0x13a   :  { %650 = vmatprep.subr.bf16.mxu1 %v794_v0 }
 0x13d   :  { %651 = vmatpush3.bf16.msra.mxu1 %v693_v53 }
 0x13e   :  { %652 = vmatprep.subr.bf16.mxu1 %v794_v0  ;;  %v397_v0 = vrot.slane %v906_v23, %v396_v3 }
 0x141   :  { %653 = vmatpush3.bf16.msra.mxu1 %v694_v54 }
 0x1f7   :  { %v254_v44 = vpop.f32.mrb[0].mxu1 }
 0x1f8   :  { %v255_v45 = vadd.f32 %v254_v44, %v171_v43  ;;  %v616_v46 = vpop.f32.mrb[1].mxu1 }
 0x1f9   :  { %v257_v47 = vpop.f32.mrb[2].mxu1 }
 0x1fa   :  { %v258_v48 = vadd.f32 %v257_v47, %v171_v43  ;;  %v617_v49 = vpop.f32.mrb[3].mxu1  ;;  %v261_v50 = vmax.f32 %v255_v45, 0.0 }
 0x1fc   :  { %v262_v51 = vmax.f32 %v258_v48, 0.0 }
 0x1fe   :  { %v263_v52 = vpack.c.bf16 %v262_v51, %v261_v50 }
 0x200   :  { %635 = vmatmul.mubr.bf16.vlgmr.msra.gmra.mrb[4].mxu0 %v263_v52 }
 0x2d3   :  { %v367_v57 = vpop.f32.mrb[4].mxu0 }
 0x2d4   :  { %v368_v58 = vadd.f32 %v367_v57, %v284_v56  ;;  %v636_v59 = vpop.f32.mrb[5].mxu0 }
 0x2d5   :  { %v370_v60 = vpop.f32.mrb[6].mxu0 }
 0x2d6   :  { %v371_v61 = vadd.f32 %v370_v60, %v284_v56  ;;  %v637_v62 = vpop.f32.mrb[7].mxu0  ;;  %v374_v63 = vmax.f32 %v368_v58, 0.0 }
 0x2d8   :  { %v375_v1 = vmax.f32 %v371_v61, 0.0 }
 0x2da   :  { %v376_v2 = vpack.c.bf16 %v375_v1, %v374_v63 }
 0x2dc   :  { %655 = vmatmul.mubr.bf16.vlgmr.msra.gmra.mrb[4].mxu1 %v376_v2 }
 0x3af   :  { %v480_v4 = vpop.f32.mrb[4].mxu1 }
 0x3b0   :  { %v656_v5 = vpop.f32.mrb[5].mxu1  ;;  %v481_v7 = vadd.f32 %v480_v4, %v397_v0 }
 0x3b1   :  { %v483_v6 = vpop.f32.mrb[6].mxu1 }
 0x3b2   :  { %v484_v8 = vadd.f32 %v483_v6, %v397_v0  ;;  %v657_v9 = vpop.f32.mrb[7].mxu1 }
 0x3b4   :  { %v552_v10 = vpack.c.bf16 %v484_v8, %v481_v7 }
 0x3b6   :  { %553 = vst [vmem:[#allocation8] sm:$0xff] %v552_v10  }
 0x3b7   :  { %772 = shalt.err (!%p769_p0)
}
 0x3b8   :  { %s773_s6 = scalar_lea.hbm %s944_s4, 128 }
 0x3b9   :  { %p774_p1 = scmp.ne.s32.totalorder %s944_s4, %s773_s6  ;;  %p777_p2 = scmp.lt.u32.totalorder %s773_s6, %s944_s4 }
 0x3bb   :  { %p779_p3 = pnand %p777_p2, %p774_p1 }
 0x3bd   :  { %782 = shalt.err (!%p779_p3)
}
 0x3be   :  { %508 = dma.vmem_to_hbm [thread:$0]  %s503_s26, 128, %s944_s4, [#allocation4], %s791_s27, %s791_s27, %s792_s28  }
 0x3bf   :  { %787 = dma.done.wait [#allocation4], 128  }
 0x3c0   :  { %788 = vsyncadd [#allocation4], 4294967168 }
 0x3c1   :  { %512 = vsyncpa [#allocation3], 1 }
 0x3c2   :  { %513 = vsyncpa [#allocation6], 1 }
 0x3c3   :  { %514 = vsyncpa [#allocation4], 1 }

</bundles_post_ra>
